<compile_context>
chip_gen: v7x
topology: tpu7x:2x2x1
jax: 0.10.0
libtpu: 0.0.40
codegen_flags: <defaults>
</compile_context>

<pallas_src>
import jax
import jax.numpy as jnp
from jax.experimental import pallas as pl
from jax.experimental.pallas import tpu as pltpu

NUM_INPUTS = 12
NUM_OUTPUTS = 4
H1, H2, H3 = 120, 60, 30

# Lane-padded widths (all hidden layers + fused head padded to a full 128-lane vreg).
H1_PAD = 128
H2_PAD = 128
H3_PAD = 128
HEAD_PAD = 128
HEAD_WIDTH = NUM_OUTPUTS + 1  # policy logits (4) || value (1)


def _round_up(x, m):
    return (x + m - 1) // m * m


def _actor_critic_kernel(
    x_ref,
    w1_ref, b1_ref,
    w2_ref, b2_ref,
    w3_ref, b3_ref,
    wh_ref, bh_ref,
    out_ref,
):
    # MXU matmuls in bf16 with f32 accumulation; elementwise chain stays f32.
    x = x_ref[...].astype(jnp.bfloat16)

    h = jnp.dot(x, w1_ref[...], preferred_element_type=jnp.float32) + b1_ref[...]
    h = jnp.maximum(h, 0.0)

    h = jnp.dot(h.astype(jnp.bfloat16), w2_ref[...],
                preferred_element_type=jnp.float32) + b2_ref[...]
    h = jnp.maximum(h, 0.0)

    h = jnp.dot(h.astype(jnp.bfloat16), w3_ref[...],
                preferred_element_type=jnp.float32) + b3_ref[...]
    h = jnp.maximum(h, 0.0)

    # Single fused head matmul -> lane-dense (TB, 128) output.
    out_ref[...] = (
        jnp.dot(h.astype(jnp.bfloat16), wh_ref[...],
                preferred_element_type=jnp.float32) + bh_ref[...]
    )


def actor_critic_forward(inputs, params, *, block_b=1024):
    """Matches ActorCritic.forward: returns (policy_logits, value).

    inputs: any shape flattening to (-1, NUM_INPUTS), like `inputs.view(-1, num_inputs)`.
    """
    x = inputs.reshape(-1, NUM_INPUTS).astype(jnp.float32)
    B = x.shape[0]

    (w1, b1), (w2, b2), (w3, b3), (wh, bh) = params

    # Batch tile: multiple of 8 (sublane), capped by block_b; pad batch to a whole
    # number of tiles (padded rows are sliced off below).
    tb = min(block_b, _round_up(B, 8))
    b_pad = _round_up(B, tb)
    if b_pad != B:
        x = jnp.pad(x, ((0, b_pad - B), (0, 0)))
    n_tiles = b_pad // tb

    const_map = lambda i: (0, 0)
    weight_specs = [
        pl.BlockSpec(w1.shape, const_map), pl.BlockSpec(b1.shape, const_map),
        pl.BlockSpec(w2.shape, const_map), pl.BlockSpec(b2.shape, const_map),
        pl.BlockSpec(w3.shape, const_map), pl.BlockSpec(b3.shape, const_map),
        pl.BlockSpec(wh.shape, const_map), pl.BlockSpec(bh.shape, const_map),
    ]

    flops = 2 * b_pad * (NUM_INPUTS * H1_PAD + H1_PAD * H2_PAD
                         + H2_PAD * H3_PAD + H3_PAD * HEAD_PAD)
    bytes_accessed = (
        b_pad * NUM_INPUTS * 4          # input activations (f32)
        + b_pad * HEAD_PAD * 4          # lane-dense output (f32)
        + sum(int(a.size) * a.dtype.itemsize
              for a in (w1, b1, w2, b2, w3, b3, wh, bh))
    )

    out = pl.pallas_call(
        _actor_critic_kernel,
        out_shape=jax.ShapeDtypeStruct((b_pad, HEAD_PAD), jnp.float32),
        grid_spec=pltpu.PrefetchScalarGridSpec(
            num_scalar_prefetch=0,
            grid=(n_tiles,),
            in_specs=[pl.BlockSpec((tb, NUM_INPUTS), lambda i: (i, 0))]
                     + weight_specs,
            out_specs=pl.BlockSpec((tb, HEAD_PAD), lambda i: (i, 0)),
        ),
        compiler_params=pltpu.CompilerParams(
            dimension_semantics=("parallel",)),
        cost_estimate=pl.CostEstimate(
            flops=flops, transcendentals=0, bytes_accessed=bytes_accessed),
    )(x, w1, b1, w2, b2, w3, b3, wh, bh)

    policy = out[:B, :NUM_OUTPUTS]
    value = out[:B, NUM_OUTPUTS:NUM_OUTPUTS + 1]
    return policy, value


def init_params(key):
    """nn.Linear-style uniform(-1/sqrt(fan_in), +) init on the logical shapes,
    zero-padded to lane-friendly widths. Weights stored transposed (in, out) in
    bf16; biases stay f32 (1, out_pad). Heads are fused: [policy | value]."""

    def _linear(k, fan_in, fan_out):
        kw, kb = jax.random.split(k)
        bound = 1.0 / float(fan_in) ** 0.5
        w = jax.random.uniform(kw, (fan_in, fan_out), jnp.float32, -bound, bound)
        b = jax.random.uniform(kb, (1, fan_out), jnp.float32, -bound, bound)
        return w, b

    def _pad(w, b, in_pad, out_pad):
        w = jnp.pad(w, ((0, in_pad - w.shape[0]), (0, out_pad - w.shape[1])))
        b = jnp.pad(b, ((0, 0), (0, out_pad - b.shape[1])))
        return w.astype(jnp.bfloat16), b  # bias stays f32 for the f32 VPU chain

    k1, k2, k3, kp, kv = jax.random.split(key, 5)
    w1, b1 = _pad(*_linear(k1, NUM_INPUTS, H1), NUM_INPUTS, H1_PAD)
    w2, b2 = _pad(*_linear(k2, H1, H2), H1_PAD, H2_PAD)
    w3, b3 = _pad(*_linear(k3, H2, H3), H2_PAD, H3_PAD)
    wp, bp = _linear(kp, H3, NUM_OUTPUTS)
    wv, bv = _linear(kv, H3, 1)
    wh = jnp.concatenate([wp, wv], axis=1)   # (30, 5): policy lanes 0-3, value lane 4
    bh = jnp.concatenate([bp, bv], axis=1)
    wh, bh = _pad(wh, bh, H3_PAD, HEAD_PAD)
    return [(w1, b1), (w2, b2), (w3, b3), (wh, bh)]


def _reference(x, params):
    """Plain-JAX reference using the same bf16-matmul / f32-accumulate recipe."""
    h = x.reshape(-1, NUM_INPUTS).astype(jnp.float32)
    for (w, b) in params[:3]:
        h = jnp.maximum(
            jnp.dot(h.astype(jnp.bfloat16), w,
                    preferred_element_type=jnp.float32) + b, 0.0)
    wh, bh = params[3]
    out = jnp.dot(h.astype(jnp.bfloat16), wh,
                  preferred_element_type=jnp.float32) + bh
    return out[:, :NUM_OUTPUTS], out[:, NUM_OUTPUTS:NUM_OUTPUTS + 1]


if __name__ == "__main__":
    key = jax.random.PRNGKey(0)
    pkey, xkey, x2key = jax.random.split(key, 3)

    params = init_params(pkey)

    # batch=2, extra leading dim 4 -> flattened to (8, 12) inside forward,
    # matching `inputs.view(-1, num_inputs)`.
    x = jax.random.normal(xkey, (2, 4, NUM_INPUTS), dtype=jnp.float32)
    policy, value = actor_critic_forward(x, params)
    jax.block_until_ready((policy, value))

    assert policy.shape == (8, NUM_OUTPUTS)
    assert value.shape == (8, 1)

    pol_ref, val_ref = _reference(x, params)
    assert jnp.allclose(policy, pol_ref, atol=1e-3, rtol=1e-3)
    assert jnp.allclose(value, val_ref, atol=1e-3, rtol=1e-3)

    # Exercise the multi-tile grid path (non-divisible batch + padding + slicing).
    x2 = jax.random.normal(x2key, (40, NUM_INPUTS), dtype=jnp.float32)
    policy2, value2 = actor_critic_forward(x2, params, block_b=16)  # grid = 3 tiles
    jax.block_until_ready((policy2, value2))
    pol2_ref, val2_ref = _reference(x2, params)
    assert policy2.shape == (40, NUM_OUTPUTS) and value2.shape == (40, 1)
    assert jnp.allclose(policy2, pol2_ref, atol=1e-3, rtol=1e-3)
    assert jnp.allclose(value2, val2_ref, atol=1e-3, rtol=1e-3)

    print("KERNEL_OK")
</pallas_src>

<mosaic_0001>
module attributes {stable_mosaic.version = 11 : i64} {
  func.func @_actor_critic_kernel(%arg0: i32, %arg1: memref<8x12xf32, #tpu.memory_space<vmem>>, %arg2: memref<12x128xbf16, #tpu.memory_space<vmem>>, %arg3: memref<1x128xf32, #tpu.memory_space<vmem>>, %arg4: memref<128x128xbf16, #tpu.memory_space<vmem>>, %arg5: memref<1x128xf32, #tpu.memory_space<vmem>>, %arg6: memref<128x128xbf16, #tpu.memory_space<vmem>>, %arg7: memref<1x128xf32, #tpu.memory_space<vmem>>, %arg8: memref<128x128xbf16, #tpu.memory_space<vmem>>, %arg9: memref<1x128xf32, #tpu.memory_space<vmem>>, %arg10: memref<8x128xf32, #tpu.memory_space<vmem>>) attributes {dimension_semantics = [#tpu.dimension_semantics<parallel>], iteration_bounds = array<i64: 1>, scalar_prefetch = 0 : i64, scratch_operands = 0 : i64, tpu.core_type = #tpu.core_type<tc>, window_params = [{transform_indices = @transform_0, window_bounds = array<i64: 8, 12>}, {pipeline_mode = #tpu.pipeline_mode<synchronous>, transform_indices = @transform_1, window_bounds = array<i64: 12, 128>}, {pipeline_mode = #tpu.pipeline_mode<synchronous>, transform_indices = @transform_2, window_bounds = array<i64: 1, 128>}, {pipeline_mode = #tpu.pipeline_mode<synchronous>, transform_indices = @transform_3, window_bounds = array<i64: 128, 128>}, {pipeline_mode = #tpu.pipeline_mode<synchronous>, transform_indices = @transform_4, window_bounds = array<i64: 1, 128>}, {pipeline_mode = #tpu.pipeline_mode<synchronous>, transform_indices = @transform_5, window_bounds = array<i64: 128, 128>}, {pipeline_mode = #tpu.pipeline_mode<synchronous>, transform_indices = @transform_6, window_bounds = array<i64: 1, 128>}, {pipeline_mode = #tpu.pipeline_mode<synchronous>, transform_indices = @transform_7, window_bounds = array<i64: 128, 128>}, {pipeline_mode = #tpu.pipeline_mode<synchronous>, transform_indices = @transform_8, window_bounds = array<i64: 1, 128>}, {transform_indices = @transform_9, window_bounds = array<i64: 8, 128>}]} {
    %c0 = arith.constant 0 : index
    %c0_0 = arith.constant 0 : index
    %0 = vector.load %arg1[%c0, %c0_0] : memref<8x12xf32, #tpu.memory_space<vmem>>, vector<8x12xf32>
    %1 = arith.truncf %0 : vector<8x12xf32> to vector<8x12xbf16>
    %c0_1 = arith.constant 0 : index
    %c0_2 = arith.constant 0 : index
    %2 = vector.load %arg2[%c0_1, %c0_2] : memref<12x128xbf16, #tpu.memory_space<vmem>>, vector<12x128xbf16>
    %cst = arith.constant dense<0.000000e+00> : vector<8x128xf32>
    %3 = tpu.matmul %1, %2, %cst {dimension_numbers = #tpu.dot_dimension_numbers<[1], [0], [0], [1], [0, 0, 1, 1], [], []>} : vector<8x12xbf16>, vector<12x128xbf16>, vector<8x128xf32> -> vector<8x128xf32>
    %c0_3 = arith.constant 0 : index
    %c0_4 = arith.constant 0 : index
    %4 = vector.load %arg3[%c0_3, %c0_4] : memref<1x128xf32, #tpu.memory_space<vmem>>, vector<1x128xf32>
    %5 = vector.broadcast %4 : vector<1x128xf32> to vector<8x128xf32>
    %6 = arith.addf %3, %5 : vector<8x128xf32>
    %cst_5 = arith.constant 0.000000e+00 : f32
    %7 = vector.broadcast %cst_5 : f32 to vector<8x128xf32>
    %8 = arith.maximumf %6, %7 : vector<8x128xf32>
    %9 = arith.truncf %8 : vector<8x128xf32> to vector<8x128xbf16>
    %c0_6 = arith.constant 0 : index
    %c0_7 = arith.constant 0 : index
    %10 = vector.load %arg4[%c0_6, %c0_7] : memref<128x128xbf16, #tpu.memory_space<vmem>>, vector<128x128xbf16>
    %cst_8 = arith.constant dense<0.000000e+00> : vector<8x128xf32>
    %11 = tpu.matmul %9, %10, %cst_8 {dimension_numbers = #tpu.dot_dimension_numbers<[1], [0], [0], [1], [0, 0, 1, 1], [], []>} : vector<8x128xbf16>, vector<128x128xbf16>, vector<8x128xf32> -> vector<8x128xf32>
    %c0_9 = arith.constant 0 : index
    %c0_10 = arith.constant 0 : index
    %12 = vector.load %arg5[%c0_9, %c0_10] : memref<1x128xf32, #tpu.memory_space<vmem>>, vector<1x128xf32>
    %13 = vector.broadcast %12 : vector<1x128xf32> to vector<8x128xf32>
    %14 = arith.addf %11, %13 : vector<8x128xf32>
    %cst_11 = arith.constant 0.000000e+00 : f32
    %15 = vector.broadcast %cst_11 : f32 to vector<8x128xf32>
    %16 = arith.maximumf %14, %15 : vector<8x128xf32>
    %17 = arith.truncf %16 : vector<8x128xf32> to vector<8x128xbf16>
    %c0_12 = arith.constant 0 : index
    %c0_13 = arith.constant 0 : index
    %18 = vector.load %arg6[%c0_12, %c0_13] : memref<128x128xbf16, #tpu.memory_space<vmem>>, vector<128x128xbf16>
    %cst_14 = arith.constant dense<0.000000e+00> : vector<8x128xf32>
    %19 = tpu.matmul %17, %18, %cst_14 {dimension_numbers = #tpu.dot_dimension_numbers<[1], [0], [0], [1], [0, 0, 1, 1], [], []>} : vector<8x128xbf16>, vector<128x128xbf16>, vector<8x128xf32> -> vector<8x128xf32>
    %c0_15 = arith.constant 0 : index
    %c0_16 = arith.constant 0 : index
    %20 = vector.load %arg7[%c0_15, %c0_16] : memref<1x128xf32, #tpu.memory_space<vmem>>, vector<1x128xf32>
    %21 = vector.broadcast %20 : vector<1x128xf32> to vector<8x128xf32>
    %22 = arith.addf %19, %21 : vector<8x128xf32>
    %cst_17 = arith.constant 0.000000e+00 : f32
    %23 = vector.broadcast %cst_17 : f32 to vector<8x128xf32>
    %24 = arith.maximumf %22, %23 : vector<8x128xf32>
    %25 = arith.truncf %24 : vector<8x128xf32> to vector<8x128xbf16>
    %c0_18 = arith.constant 0 : index
    %c0_19 = arith.constant 0 : index
    %26 = vector.load %arg8[%c0_18, %c0_19] : memref<128x128xbf16, #tpu.memory_space<vmem>>, vector<128x128xbf16>
    %cst_20 = arith.constant dense<0.000000e+00> : vector<8x128xf32>
    %27 = tpu.matmul %25, %26, %cst_20 {dimension_numbers = #tpu.dot_dimension_numbers<[1], [0], [0], [1], [0, 0, 1, 1], [], []>} : vector<8x128xbf16>, vector<128x128xbf16>, vector<8x128xf32> -> vector<8x128xf32>
    %c0_21 = arith.constant 0 : index
    %c0_22 = arith.constant 0 : index
    %28 = vector.load %arg9[%c0_21, %c0_22] : memref<1x128xf32, #tpu.memory_space<vmem>>, vector<1x128xf32>
    %29 = vector.broadcast %28 : vector<1x128xf32> to vector<8x128xf32>
    %30 = arith.addf %27, %29 : vector<8x128xf32>
    %c0_23 = arith.constant 0 : index
    %c0_24 = arith.constant 0 : index
    %31 = vector.load %arg10[%c0_23, %c0_24] : memref<8x128xf32, #tpu.memory_space<vmem>>, vector<8x128xf32>
    tpu.vector_store %arg10[%c0_23, %c0_24], %30 {strides = array<i32>} : memref<8x128xf32, #tpu.memory_space<vmem>>, vector<8x128xf32>,
    return
  }
  func.func @transform_0(%arg0: i32) -> (i32, i32) {
    %c0_i32 = arith.constant 0 : i32
    %c0_i32_0 = arith.constant 0 : i32
    return %arg0, %c0_i32 : i32, i32
  }
  func.func @transform_1(%arg0: i32) -> (i32, i32) {
    %c0_i32 = arith.constant 0 : i32
    %c0_i32_0 = arith.constant 0 : i32
    %c0_i32_1 = arith.constant 0 : i32
    return %c0_i32, %c0_i32_0 : i32, i32
  }
  func.func @transform_2(%arg0: i32) -> (i32, i32) {
    %c0_i32 = arith.constant 0 : i32
    %c0_i32_0 = arith.constant 0 : i32
    %c0_i32_1 = arith.constant 0 : i32
    return %c0_i32, %c0_i32_0 : i32, i32
  }
  func.func @transform_3(%arg0: i32) -> (i32, i32) {
    %c0_i32 = arith.constant 0 : i32
    %c0_i32_0 = arith.constant 0 : i32
    %c0_i32_1 = arith.constant 0 : i32
    return %c0_i32, %c0_i32_0 : i32, i32
  }
  func.func @transform_4(%arg0: i32) -> (i32, i32) {
    %c0_i32 = arith.constant 0 : i32
    %c0_i32_0 = arith.constant 0 : i32
    %c0_i32_1 = arith.constant 0 : i32
    return %c0_i32, %c0_i32_0 : i32, i32
  }
  func.func @transform_5(%arg0: i32) -> (i32, i32) {
    %c0_i32 = arith.constant 0 : i32
    %c0_i32_0 = arith.constant 0 : i32
    %c0_i32_1 = arith.constant 0 : i32
    return %c0_i32, %c0_i32_0 : i32, i32
  }
  func.func @transform_6(%arg0: i32) -> (i32, i32) {
    %c0_i32 = arith.constant 0 : i32
    %c0_i32_0 = arith.constant 0 : i32
    %c0_i32_1 = arith.constant 0 : i32
    return %c0_i32, %c0_i32_0 : i32, i32
  }
  func.func @transform_7(%arg0: i32) -> (i32, i32) {
    %c0_i32 = arith.constant 0 : i32
    %c0_i32_0 = arith.constant 0 : i32
    %c0_i32_1 = arith.constant 0 : i32
    return %c0_i32, %c0_i32_0 : i32, i32
  }
  func.func @transform_8(%arg0: i32) -> (i32, i32) {
    %c0_i32 = arith.constant 0 : i32
    %c0_i32_0 = arith.constant 0 : i32
    %c0_i32_1 = arith.constant 0 : i32
    return %c0_i32, %c0_i32_0 : i32, i32
  }
  func.func @transform_9(%arg0: i32) -> (i32, i32) {
    %c0_i32 = arith.constant 0 : i32
    %c0_i32_0 = arith.constant 0 : i32
    return %arg0, %c0_i32 : i32, i32
  }
}

</mosaic_0001>

<bundles_post_ra>
// kernel: tpu_custom_call.1
= control target key start
LH: loop header
LB: loop body
LE: loop exit
PB: predicated region body
PF: predicated region fallthrough
CT: control target
= control target key end

     0   :  { %14 = vsyncpa [#allocation3], 0  ;;  %s1010_s0 = inlined_call_operand.hbm [shape: f32[8,12], index: 0, kind: input, shape index: {}]   ;;  %s1011_s1 = inlined_call_operand.hbm [shape: bf16[12,128], index: 1, kind: input, shape index: {}]   ;;  %s1012_s2 = inlined_call_operand.vmem [shape: f32[1,128], index: 2, kind: input, shape index: {}]   ;;  %s1013_s3 = inlined_call_operand.hbm [shape: bf16[128,128], index: 3, kind: input, shape index: {}]   ;;  %s1014_s4 = inlined_call_operand.vmem [shape: f32[1,128], index: 4, kind: input, shape index: {}]   ;;  %s1015_s5 = inlined_call_operand.hbm [shape: bf16[128,128], index: 5, kind: input, shape index: {}]   ;;  %s1016_s6 = inlined_call_operand.vmem [shape: f32[1,128], index: 6, kind: input, shape index: {}]   ;;  %s1017_s7 = inlined_call_operand.hbm [shape: bf16[128,128], index: 7, kind: input, shape index: {}]   ;;  %s1018_s8 = inlined_call_operand.vmem [shape: f32[1,128], index: 8, kind: input, shape index: {}]   ;;  %s1019_s9 = inlined_call_operand.hbm [shape: f32[8,128], index: 9, kind: output, shape index: {}]  }
   0x1   :  { %15 = vsyncpa [#allocation6], 0 }
   0x2   :  { %16 = vsyncpa [#allocation9], 0 }
   0x3   :  { %17 = vsyncpa [#allocation4], 0  ;;  %s821_s30 = smov [#allocation5]   ;;  %s681_s13 = scalar_lea.hbm %s1011_s1, 128 }
   0x4   :  { %s33_s10 = sshll.u32 %s821_s30, 4  ;;  %p682_p0 = scmp.ne.s32.totalorder %s1011_s1, %s681_s13  ;;  %s34_s10 = int_to_ptr.vmem [resolvable:$true] %s33_s10 }
   0x5   :  { %p685_p1 = scmp.lt.u32.totalorder %s681_s13, %s1011_s1 }
   0x7   :  { %p687_p2 = pnand %p685_p1, %p682_p0 }
   0x9   :  { %690 = shalt.err (!%p687_p2)
}
   0xa   :  { %s691_s18 = scalar_lea.vmem %s34_s10, 128  ;;  %p696_p4 = scmp.lt.s32.totalorder %s34_s10, %s34_s10 }
   0xb   :  { %p692_p3 = scmp.ne.s32.totalorder %s34_s10, %s691_s18  ;;  %p697_p5 = scmp.lt.s32.totalorder %s691_s18, %s691_s18 }
   0xd   :  { %p698_p6 = por %p697_p5, %p696_p4 }
   0xf   :  { %p699_p7 = pnand %p698_p6, %p692_p3 }
  0x11   :  { %702 = shalt.err (!%p699_p7)
}
  0x12   :  { %s822_s19 = smov 64   ;;  %s823_s20 = smov 4  }
  0x13   :  { %39 = dma.hbm_to_vmem [thread:$0]  %s1011_s1, 128, %s34_s10, [#allocation6], %s822_s19, %s822_s19, %s823_s20  }
  0x14   :  { %s824_s23 = smov [#allocation8]   ;;  %s825_s25 = smov [#allocation2]  }
  0x15   :  { %s61_s24 = sshll.u32 %s824_s23, 4  ;;  %s24_s26 = sshll.u32 %s825_s25, 4  ;;  %s62_s24 = int_to_ptr.vmem [resolvable:$true] %s61_s24  ;;  %s25_s26 = int_to_ptr.vmem [resolvable:$true] %s24_s26 }
  0x16   :  { %s703_s29 = scalar_lea.hbm %s1015_s5, 1024 }
  0x17   :  { %p704_p8 = scmp.ne.s32.totalorder %s1015_s5, %s703_s29  ;;  %p707_p9 = scmp.lt.u32.totalorder %s703_s29, %s1015_s5 }
  0x19   :  { %p709_p10 = pnand %p707_p9, %p704_p8 }
  0x1b   :  { %712 = shalt.err (!%p709_p10)
}
  0x1c   :  { %s713_s1 = scalar_lea.vmem %s62_s24, 1024  ;;  %p718_p12 = scmp.lt.s32.totalorder %s62_s24, %s62_s24 }
  0x1d   :  { %p714_p11 = scmp.ne.s32.totalorder %s62_s24, %s713_s1  ;;  %p719_p13 = scmp.lt.s32.totalorder %s713_s1, %s713_s1 }
  0x1f   :  { %p720_p0 = por %p719_p13, %p718_p12 }
  0x21   :  { %p721_p1 = pnand %p720_p0, %p714_p11 }
  0x23   :  { %724 = shalt.err (!%p721_p1)
}
  0x24   :  { %67 = dma.hbm_to_vmem [thread:$0]  %s1015_s5, 1024, %s62_s24, [#allocation9], %s822_s19, %s822_s19, %s823_s20  }
  0x25   :  { %s725_s17 = scalar_lea.hbm %s1010_s0, 128 }
  0x26   :  { %p726_p2 = scmp.ne.s32.totalorder %s1010_s0, %s725_s17  ;;  %p729_p3 = scmp.lt.u32.totalorder %s725_s17, %s1010_s0 }
  0x28   :  { %p731_p4 = pnand %p729_p3, %p726_p2 }
  0x2a   :  { %734 = shalt.err (!%p731_p4)
}
  0x2b   :  { %s735_s25 = scalar_lea.vmem %s25_s26, 128  ;;  %p740_p6 = scmp.lt.s32.totalorder %s25_s26, %s25_s26 }
  0x2c   :  { %p736_p5 = scmp.ne.s32.totalorder %s25_s26, %s735_s25  ;;  %p741_p7 = scmp.lt.s32.totalorder %s735_s25, %s735_s25 }
  0x2e   :  { %p742_p8 = por %p741_p7, %p740_p6 }
  0x30   :  { %p743_p9 = pnand %p742_p8, %p736_p5 }
  0x32   :  { %746 = shalt.err (!%p743_p9)
}
  0x33   :  { %27 = dma.hbm_to_vmem [thread:$0]  %s1010_s0, 128, %s25_s26, [#allocation3]  }
  0x34   :  { %s826_s27 = smov [#allocation7]   ;;  %s827_s29 = smov [#allocation10]  }
  0x35   :  { %s47_s28 = sshll.u32 %s826_s27, 4  ;;  %s75_s30 = sshll.u32 %s827_s29, 4  ;;  %s48_s28 = int_to_ptr.vmem [resolvable:$true] %s47_s28  ;;  %s76_s30 = int_to_ptr.vmem [resolvable:$true] %s75_s30 }
  0x36   :  { %s747_s13 = scalar_lea.hbm %s1013_s3, 1024 }
  0x37   :  { %p748_p10 = scmp.ne.s32.totalorder %s1013_s3, %s747_s13  ;;  %p751_p11 = scmp.lt.u32.totalorder %s747_s13, %s1013_s3 }
  0x39   :  { %p753_p12 = pnand %p751_p11, %p748_p10 }
  0x3b   :  { %756 = shalt.err (!%p753_p12)
}
  0x3c   :  { %s757_s0 = scalar_lea.vmem %s48_s28, 1024  ;;  %p762_p0 = scmp.lt.s32.totalorder %s48_s28, %s48_s28 }
  0x3d   :  { %p758_p13 = scmp.ne.s32.totalorder %s48_s28, %s757_s0  ;;  %p763_p1 = scmp.lt.s32.totalorder %s757_s0, %s757_s0 }
  0x3f   :  { %p764_p2 = por %p763_p1, %p762_p0 }
  0x41   :  { %p765_p3 = pnand %p764_p2, %p758_p13 }
  0x43   :  { %768 = shalt.err (!%p765_p3)
}
  0x44   :  { %53 = dma.hbm_to_vmem [thread:$0]  %s1013_s3, 1024, %s48_s28, [#allocation6], %s822_s19, %s822_s19, %s823_s20  }
  0x45   :  { %s769_s21 = scalar_lea.hbm %s1017_s7, 1024 }
  0x46   :  { %p770_p4 = scmp.ne.s32.totalorder %s1017_s7, %s769_s21  ;;  %p773_p5 = scmp.lt.u32.totalorder %s769_s21, %s1017_s7 }
  0x48   :  { %p775_p6 = pnand %p773_p5, %p770_p4 }
  0x4a   :  { %778 = shalt.err (!%p775_p6)
}
  0x4b   :  { %s779_s24 = scalar_lea.vmem %s76_s30, 1024  ;;  %p784_p8 = scmp.lt.s32.totalorder %s76_s30, %s76_s30 }
  0x4c   :  { %p780_p7 = scmp.ne.s32.totalorder %s76_s30, %s779_s24  ;;  %p785_p9 = scmp.lt.s32.totalorder %s779_s24, %s779_s24 }
  0x4e   :  { %p786_p10 = por %p785_p9, %p784_p8 }
  0x50   :  { %p787_p11 = pnand %p786_p10, %p780_p7 }
  0x52   :  { %790 = shalt.err (!%p787_p11)
}
  0x53   :  { %81 = dma.hbm_to_vmem [thread:$0]  %s1017_s7, 1024, %s76_s30, [#allocation9], %s822_s19, %s822_s19, %s823_s20  }
  0x54   :  { %813 = dma.done.wait [#allocation3], 128  }
  0x55   :  { %814 = vsyncadd [#allocation3], 4294967168 }
  0x56   :  { %815 = dma.done.wait [#allocation6], 1152  }
  0x57   :  { %816 = vsyncadd [#allocation6], 4294966144 }
  0x58   :  { %817 = dma.done.wait [#allocation9], 2048  }
  0x59   :  { %818 = vsyncadd [#allocation9], 4294965248  ;;  %v828_v0 = vmov 0.0   ;;  %vm829_vm0 = vmmov 0   ;;  %vm120_vm1 = vcmask 1045504   ;;  %v100_v2 = vld [vmem:[#allocation2] sm:$0xff] }
  0x5a   :  { %580 = vmatprep.subr.bf16.mxu0 %v828_v0  ;;  %582 = vmatprep.mubr.msk.bf16.mxu0 %vm829_vm0, %v828_v0  ;;  %v656_v1 = vld [vmem:[#allocation5] sm:$0x3f]   ;;  %v101_v4 = vpack.c.bf16 %v100_v2, %v100_v2  ;;  %v657_v5 = vld [vmem:[#allocation7] sm:$0xff]   ;;  %vm116_vm2 = vcmask 97280   ;;  %v658_v6 = vld [vmem:[#allocation7 + $0x8] sm:$0xff]   ;;  %s830_s11 = smov [#allocation11]  }
  0x5b   :  { %586 = vmatprep.subr.bf16.mxu1 %v828_v0  ;;  %602 = vmatprep.mubr.msk.bf16.mxu1 %vm829_vm0, %v828_v0  ;;  %v122_v3 = vsel %vm120_vm1, %v656_v1, 0  ;;  %v659_v7 = vld [vmem:[#allocation7 + $0x10] sm:$0xff]   ;;  %v660_v8 = vld [vmem:[#allocation7 + $0x18] sm:$0xff]   ;;  %v661_v9 = vld [vmem:[#allocation7 + $0x20] sm:$0xff]   ;;  %s510_s12 = sshll.u32 %s830_s11, 4  ;;  %s511_s12 = int_to_ptr.vmem [resolvable:$true] %s510_s12 }
  0x5c   :  { %581 = vmatpush3.bf16.msra.mxu0 %v122_v3  ;;  %587 = vmatpush3.bf16.msra.mxu1 %v657_v5  ;;  %v662_v10 = vld [vmem:[#allocation7 + $0x28] sm:$0xff]   ;;  %v663_v11 = vld [vmem:[#allocation7 + $0x30] sm:$0xff]   ;;  %v664_v12 = vld [vmem:[#allocation7 + $0x38] sm:$0xff]   ;;  %p796_p13 = scmp.lt.s32.totalorder %s511_s12, %s511_s12 }
  0x5d   :  { %606 = vmatprep.subr.bf16.mxu0 %v828_v0  ;;  %588 = vmatprep.subr.bf16.mxu1 %v828_v0  ;;  %v665_v13 = vld [vmem:[#allocation8] sm:$0xff]   ;;  %v666_v14 = vld [vmem:[#allocation8 + $0x8] sm:$0xff]   ;;  %v667_v15 = vld [vmem:[#allocation8 + $0x10] sm:$0xff]  }
  0x5e   :  { %v668_v16 = vld [vmem:[#allocation8 + $0x18] sm:$0xff]   ;;  %v669_v17 = vld [vmem:[#allocation8 + $0x20] sm:$0xff]   ;;  %v670_v18 = vld [vmem:[#allocation8 + $0x28] sm:$0xff]  }
  0x5f   :  { %583 = vmatmul.mubr.msk.bf16.vlgmr.msra.gmra.mrb[0].mxu0 %vm116_vm2, %v101_v4  ;;  %v521_v19 = vld [vmem:[%s1012_s2] ss:$0 sm:$0xff]  ;;  %v672_v28 = vld [vmem:[#allocation8 + $0x38] sm:$0xff]   ;;  %v673_v29 = vld [vmem:[#allocation10] sm:$0xff]  }
  0x60   :  { %622 = vmatprep.mubr.msk.bf16.mxu0 %vm829_vm0, %v828_v0  ;;  %589 = vmatpush3.bf16.msra.mxu1 %v658_v6  ;;  %v671_v27 = vld [vmem:[#allocation8 + $0x30] sm:$0xff]   ;;  %v674_v30 = vld [vmem:[#allocation10 + $0x8] sm:$0xff]   ;;  %v676_v32 = vld [vmem:[#allocation10 + $0x18] sm:$0xff]  }
  0x61   :  { %590 = vmatprep.subr.bf16.mxu1 %v828_v0  ;;  %607 = vmatpush3.bf16.msra.mxu0 %v665_v13  ;;  %v675_v31 = vld [vmem:[#allocation10 + $0x10] sm:$0xff]   ;;  %v677_v33 = vld [vmem:[#allocation10 + $0x20] sm:$0xff]   ;;  %v678_v34 = vld [vmem:[#allocation10 + $0x28] sm:$0xff]  }
  0x62   :  { %608 = vmatprep.subr.bf16.mxu0 %v828_v0  ;;  %v524_v35 = vld [vmem:[%s1014_s4] ss:$0 sm:$0xff]  ;;  %v680_v44 = vld [vmem:[#allocation10 + $0x38] sm:$0xff]  }
  0x63   :  { %v679_v43 = vld [vmem:[#allocation10 + $0x30] sm:$0xff]  }
  0x64   :  { %591 = vmatpush3.bf16.msra.mxu1 %v659_v7  ;;  %v533_v45 = vld [vmem:[%s1016_s6] ss:$0 sm:$0xff]  ;;  %s791_s6 = scalar_lea.vmem %s511_s12, 128 }
  0x65   :  { %592 = vmatprep.subr.bf16.mxu1 %v828_v0  ;;  %609 = vmatpush3.bf16.msra.mxu0 %v666_v14  ;;  %v542_v53 = vld [vmem:[%s1018_s8] ss:$0 sm:$0xff]  ;;  %p792_p12 = scmp.ne.s32.totalorder %s511_s12, %s791_s6  ;;  %p797_p0 = scmp.lt.s32.totalorder %s791_s6, %s791_s6 }
  0x66   :  { %610 = vmatprep.subr.bf16.mxu0 %v828_v0 }
  0x67   :  { %p798_p1 = por %p797_p0, %p796_p13 }
  0x68   :  { %593 = vmatpush3.bf16.msra.mxu1 %v660_v8 }
  0x69   :  { %594 = vmatprep.subr.bf16.mxu1 %v828_v0  ;;  %611 = vmatpush3.bf16.msra.mxu0 %v667_v15  ;;  %p799_p2 = pnand %p798_p1, %p792_p12 }
  0x6a   :  { %612 = vmatprep.subr.bf16.mxu0 %v828_v0 }
  0x6c   :  { %595 = vmatpush3.bf16.msra.mxu1 %v661_v9 }
  0x6d   :  { %596 = vmatprep.subr.bf16.mxu1 %v828_v0  ;;  %613 = vmatpush3.bf16.msra.mxu0 %v668_v16 }
  0x6e   :  { %614 = vmatprep.subr.bf16.mxu0 %v828_v0 }
  0x70   :  { %597 = vmatpush3.bf16.msra.mxu1 %v662_v10 }
  0x71   :  { %598 = vmatprep.subr.bf16.mxu1 %v828_v0  ;;  %615 = vmatpush3.bf16.msra.mxu0 %v669_v17 }
  0x72   :  { %616 = vmatprep.subr.bf16.mxu0 %v828_v0 }
  0x74   :  { %599 = vmatpush3.bf16.msra.mxu1 %v663_v11 }
  0x75   :  { %600 = vmatprep.subr.bf16.mxu1 %v828_v0  ;;  %617 = vmatpush3.bf16.msra.mxu0 %v670_v18 }
  0x76   :  { %618 = vmatprep.subr.bf16.mxu0 %v828_v0 }
  0x78   :  { %601 = vmatpush3.bf16.msra.mxu1 %v664_v12 }
  0x79   :  { %626 = vmatprep.subr.bf16.mxu1 %v828_v0  ;;  %619 = vmatpush3.bf16.msra.mxu0 %v671_v27 }
  0x7a   :  { %620 = vmatprep.subr.bf16.mxu0 %v828_v0 }
  0x7d   :  { %621 = vmatpush3.bf16.msra.mxu0 %v672_v28 }
 0x132   :  { %v158_v20 = vpop.f32.mrb[0].mxu0 }
 0x133   :  { %v159_v21 = vadd.f32 %v521_v19, %v158_v20  ;;  %v584_v22 = vpop.f32.mrb[1].mxu0 }
 0x134   :  { %v161_v23 = vpop.f32.mrb[2].mxu0 }
 0x135   :  { %v164_v24 = vmax.f32 %v159_v21, 0.0  ;;  %v585_v25 = vpop.f32.mrb[3].mxu0 }
 0x137   :  { %v165_v26 = vpack.c.bf16 %v164_v24, %v164_v24 }
 0x139   :  { %603 = vmatmul.mubr.bf16.vlgmr.msra.gmra.mrb[0].mxu1 %v165_v26 }
 0x13a   :  { %642 = vmatprep.mubr.msk.bf16.mxu1 %vm829_vm0, %v828_v0  ;;  %627 = vmatpush3.bf16.msra.mxu1 %v673_v29 }
 0x13b   :  { %628 = vmatprep.subr.bf16.mxu1 %v828_v0 }
 0x13e   :  { %629 = vmatpush3.bf16.msra.mxu1 %v674_v30 }
 0x13f   :  { %630 = vmatprep.subr.bf16.mxu1 %v828_v0 }
 0x142   :  { %631 = vmatpush3.bf16.msra.mxu1 %v675_v31 }
 0x143   :  { %632 = vmatprep.subr.bf16.mxu1 %v828_v0 }
 0x146   :  { %633 = vmatpush3.bf16.msra.mxu1 %v676_v32 }
 0x147   :  { %634 = vmatprep.subr.bf16.mxu1 %v828_v0 }
 0x14a   :  { %635 = vmatpush3.bf16.msra.mxu1 %v677_v33 }
 0x14b   :  { %636 = vmatprep.subr.bf16.mxu1 %v828_v0 }
 0x14e   :  { %637 = vmatpush3.bf16.msra.mxu1 %v678_v34 }
 0x14f   :  { %638 = vmatprep.subr.bf16.mxu1 %v828_v0 }
 0x152   :  { %639 = vmatpush3.bf16.msra.mxu1 %v679_v43 }
 0x153   :  { %640 = vmatprep.subr.bf16.mxu1 %v828_v0 }
 0x156   :  { %641 = vmatpush3.bf16.msra.mxu1 %v680_v44 }
 0x20c   :  { %v271_v36 = vpop.f32.mrb[0].mxu1 }
 0x20d   :  { %v272_v37 = vadd.f32 %v524_v35, %v271_v36  ;;  %v604_v38 = vpop.f32.mrb[1].mxu1 }
 0x20e   :  { %v274_v39 = vpop.f32.mrb[2].mxu1 }
 0x20f   :  { %v277_v40 = vmax.f32 %v272_v37, 0.0  ;;  %v605_v41 = vpop.f32.mrb[3].mxu1 }
 0x211   :  { %v278_v42 = vpack.c.bf16 %v277_v40, %v277_v40 }
 0x213   :  { %623 = vmatmul.mubr.bf16.vlgmr.msra.gmra.mrb[4].mxu0 %v278_v42 }
 0x2e6   :  { %v384_v46 = vpop.f32.mrb[4].mxu0 }
 0x2e7   :  { %v385_v47 = vadd.f32 %v533_v45, %v384_v46  ;;  %v624_v48 = vpop.f32.mrb[5].mxu0 }
 0x2e8   :  { %v387_v49 = vpop.f32.mrb[6].mxu0 }
 0x2e9   :  { %v390_v50 = vmax.f32 %v385_v47, 0.0  ;;  %v625_v51 = vpop.f32.mrb[7].mxu0 }
 0x2eb   :  { %v391_v52 = vpack.c.bf16 %v390_v50, %v390_v50 }
 0x2ed   :  { %643 = vmatmul.mubr.bf16.vlgmr.msra.gmra.mrb[4].mxu1 %v391_v52 }
 0x3c0   :  { %v497_v54 = vpop.f32.mrb[4].mxu1 }
 0x3c1   :  { %v498_v55 = vadd.f32 %v542_v53, %v497_v54  ;;  %v644_v56 = vpop.f32.mrb[5].mxu1 }
 0x3c2   :  { %v500_v57 = vpop.f32.mrb[6].mxu1 }
 0x3c3   :  { %503 = vst [vmem:[#allocation11] sm:$0xff] %v498_v55  ;;  %v645_v58 = vpop.f32.mrb[7].mxu1 }
 0x3c4   :  { %802 = shalt.err (!%p799_p2)
}
 0x3c5   :  { %s803_s8 = scalar_lea.hbm %s1019_s9, 128 }
 0x3c6   :  { %p804_p3 = scmp.ne.s32.totalorder %s1019_s9, %s803_s8  ;;  %p807_p4 = scmp.lt.u32.totalorder %s803_s8, %s1019_s9 }
 0x3c8   :  { %p809_p5 = pnand %p807_p4, %p804_p3 }
 0x3ca   :  { %812 = shalt.err (!%p809_p5)
}
 0x3cb   :  { %513 = dma.vmem_to_hbm [thread:$0]  %s511_s12, 128, %s1019_s9, [#allocation4]  }
 0x3cc   :  { %819 = dma.done.wait [#allocation4], 128  }
 0x3cd   :  { %820 = vsyncadd [#allocation4], 4294967168 }
 0x3ce   :  { %517 = vsyncpa [#allocation3], 1 }
 0x3cf   :  { %518 = vsyncpa [#allocation6], 1 }
 0x3d0   :  { %519 = vsyncpa [#allocation9], 1 }
 0x3d1   :  { %520 = vsyncpa [#allocation4], 1 }

</bundles_post_ra>
